<compile_context>
chip_gen: v7x
topology: tpu7x:2x2x1
jax: 0.10.0
libtpu: 0.0.40
codegen_flags: <defaults>
</compile_context>

<pallas_src>
import functools

import jax
import jax.numpy as jnp
from jax.experimental import pallas as pl
from jax.experimental.pallas import tpu as pltpu


def _round_up(v, m):
    return (v + m - 1) // m * m


# ---------------------------------------------------------------------------
# Pass 1: fused Q/K/V projection, computed exactly once.
# ---------------------------------------------------------------------------
def _qkv_proj_kernel(x_ref, w_ref, b_ref, q_ref, k_ref, v_ref, *, dp, tr, n_valid):
    acc = jnp.dot(x_ref[...], w_ref[...], preferred_element_type=jnp.float32)
    qkv = jnp.maximum(acc + b_ref[...], 0.0)

    # Padded x rows are zero, so a padded row projects to relu(bias) != 0.
    # Zero K/V rows beyond the true sequence length so padded KV positions
    # contribute nothing to att @ v.  (Padded Q rows are sliced off outside.)
    row = pl.program_id(0) * tr + jax.lax.broadcasted_iota(jnp.int32, (tr, 1), 0)
    valid = row < n_valid

    q_ref[...] = qkv[:, :dp].astype(q_ref.dtype)
    k_ref[...] = jnp.where(valid, qkv[:, dp:2 * dp], 0.0).astype(k_ref.dtype)
    v_ref[...] = jnp.where(valid, qkv[:, 2 * dp:], 0.0).astype(v_ref.dtype)


# ---------------------------------------------------------------------------
# Pass 2: flash-style attention (no softmax -> straight accumulation).
# ---------------------------------------------------------------------------
def _attention_kernel(q_ref, k_ref, v_ref, o_ref, acc_ref, *, alpha):
    @pl.when(pl.program_id(1) == 0)
    def _init():
        acc_ref[...] = jnp.zeros_like(acc_ref)

    # scores for this (TQ, TK) tile; contract last dims of both operands
    # (NT layout, same dimension_numbers the reference flash-attention kernel uses).
    s = jax.lax.dot_general(
        q_ref[...], k_ref[...],
        dimension_numbers=(((1,), (1,)), ((), ())),
        preferred_element_type=jnp.float32)

    # LeakyReLU(alpha), 0 < alpha < 1  =>  max(x, alpha * x)  (mul + max only)
    s = jnp.maximum(s, alpha * s)

    acc_ref[...] += jnp.dot(s.astype(v_ref.dtype), v_ref[...],
                            preferred_element_type=jnp.float32)

    @pl.when(pl.program_id(1) == pl.num_programs(1) - 1)
    def _store():
        o_ref[...] = acc_ref[...].astype(o_ref.dtype)


def attention_pallas(x, wq, bq, wk, bk, wv, bv, alpha):
    """x: (N, Din); wX: (Din, Dout) (pre-transposed Linear weights); bX: (Dout,)."""
    alpha = float(alpha)
    assert 0.0 < alpha < 1.0, "leaky-relu-as-max trick requires 0 < alpha < 1"

    n, din = x.shape
    dout = wq.shape[1]
    dtype = x.dtype
    itemsize = jnp.dtype(dtype).itemsize

    din_p = _round_up(din, 128)              # lane-dense contraction dim
    dp = _round_up(dout, 128)                # lane-dense q/k/v and output

    # Tile selection. Flash tiling keeps VMEM independent of N.
    n128 = _round_up(n, 128)
    if n128 <= 512:
        # Small problem: single grid step per axis; grid overhead dominates
        # anyway when the padded contraction is mostly zeros.
        tq = tk = tr = n128
    else:
        tq, tk, tr = 256, 512, 256           # tk multiple of tq/tr -> all divide n_p
    n_p = _round_up(n, tk)

    # Zero padding of feature dims is mathematically inert (zero x cols meet
    # zero weight rows; padded weight cols give zero q/k/v columns).
    x_p = jnp.pad(x, ((0, n_p - n), (0, din_p - din)))

    def pad_wb(w, b):
        wp = jnp.pad(w, ((0, din_p - din), (0, dp - dout)))
        bp = jnp.pad(b, (0, dp - dout)).reshape(1, dp)
        return wp, bp

    wq_p, bq_p = pad_wb(wq, bq)
    wk_p, bk_p = pad_wb(wk, bk)
    wv_p, bv_p = pad_wb(wv, bv)
    wqkv = jnp.concatenate([wq_p, wk_p, wv_p], axis=1)       # (Din_p, 3*Dp)
    bqkv = jnp.concatenate([bq_p, bk_p, bv_p], axis=1)       # (1, 3*Dp)

    # ---------------- pass 1: projection ----------------
    proj_block_bytes = (tr * din_p + din_p * 3 * dp + 3 * dp + 3 * tr * dp) * itemsize
    proj_vmem = int(min(max(4 * proj_block_bytes + tr * 3 * dp * 4 + (8 << 20),
                            32 << 20), 100 << 20))
    proj_cost = pl.CostEstimate(
        flops=2 * n_p * din_p * 3 * dp,
        transcendentals=0,
        bytes_accessed=(n_p * din_p + din_p * 3 * dp + 3 * dp
                        + 3 * n_p * dp) * itemsize)

    q_all, k_all, v_all = pl.pallas_call(
        functools.partial(_qkv_proj_kernel, dp=dp, tr=tr, n_valid=n),
        out_shape=(jax.ShapeDtypeStruct((n_p, dp), dtype),
                   jax.ShapeDtypeStruct((n_p, dp), dtype),
                   jax.ShapeDtypeStruct((n_p, dp), dtype)),
        grid=(n_p // tr,),
        in_specs=[
            pl.BlockSpec((tr, din_p), lambda i: (i, 0)),        # x row tile
            pl.BlockSpec((din_p, 3 * dp), lambda i: (0, 0)),    # fused Wq|Wk|Wv
            pl.BlockSpec((1, 3 * dp), lambda i: (0, 0)),        # fused bq|bk|bv
        ],
        out_specs=(pl.BlockSpec((tr, dp), lambda i: (i, 0)),
                   pl.BlockSpec((tr, dp), lambda i: (i, 0)),
                   pl.BlockSpec((tr, dp), lambda i: (i, 0))),
        compiler_params=pltpu.CompilerParams(
            dimension_semantics=("parallel",),
            vmem_limit_bytes=proj_vmem),
        cost_estimate=proj_cost,
    )(x_p, wqkv, bqkv)

    # ---------------- pass 2: flash-style attention ----------------
    n_q_tiles = n_p // tq
    n_kv_tiles = n_p // tk
    att_block_bytes = (2 * tq * dp + 2 * tk * dp) * itemsize
    att_scratch_bytes = tq * dp * 4 + tq * tk * 4
    att_vmem = int(min(max(4 * att_block_bytes + 2 * att_scratch_bytes + (8 << 20),
                           32 << 20), 100 << 20))
    att_cost = pl.CostEstimate(
        flops=4 * n_p * n_p * dp,
        transcendentals=0,
        bytes_accessed=(n_p * dp                       # q (read once per q tile)
                        + 2 * n_q_tiles * n_p * dp     # k, v re-read per q tile
                        + n_p * dp) * itemsize)        # output

    out_p = pl.pallas_call(
        functools.partial(_attention_kernel, alpha=alpha),
        out_shape=jax.ShapeDtypeStruct((n_p, dp), dtype),
        grid=(n_q_tiles, n_kv_tiles),
        in_specs=[
            pl.BlockSpec((tq, dp), lambda i, j: (i, 0)),        # q tile
            pl.BlockSpec((tk, dp), lambda i, j: (j, 0)),        # k tile
            pl.BlockSpec((tk, dp), lambda i, j: (j, 0)),        # v tile
        ],
        out_specs=pl.BlockSpec((tq, dp), lambda i, j: (i, 0)),
        scratch_shapes=[pltpu.VMEM((tq, dp), jnp.float32)],
        compiler_params=pltpu.CompilerParams(
            dimension_semantics=("parallel", "arbitrary"),
            vmem_limit_bytes=att_vmem),
        cost_estimate=att_cost,
    )(q_all, k_all, v_all)

    return out_p[:n, :dout]


def attention_ref(x, wq, bq, wk, bk, wv, bv, alpha):
    """Pure-JAX reference mirroring the PyTorch forward."""
    q = jax.nn.relu(x @ wq + bq)
    k = jax.nn.relu(x @ wk + bk)
    v = jax.nn.relu(x @ wv + bv)
    att = q @ k.T
    att = jnp.where(att >= 0.0, att, alpha * att)
    return att @ v


if __name__ == "__main__":
    key = jax.random.PRNGKey(0)
    n = 8                 # number of "nodes" / tokens
    in_features = 32
    out_features = 32
    alpha = 0.2

    ks = jax.random.split(key, 7)
    x = jax.random.normal(ks[0], (n, in_features), dtype=jnp.float32)

    # PyTorch Linear stores (out, in); we keep (in, out) so the kernel does x @ W.
    def init_linear(kw, kb):
        bound = 1.0 / (in_features ** 0.5)
        w = jax.random.uniform(kw, (in_features, out_features),
                               minval=-bound, maxval=bound, dtype=jnp.float32)
        b = jax.random.uniform(kb, (out_features,),
                               minval=-bound, maxval=bound, dtype=jnp.float32)
        return w, b

    wq, bq = init_linear(ks[1], ks[2])
    wk, bk = init_linear(ks[3], ks[4])
    wv, bv = init_linear(ks[5], ks[6])

    out = attention_pallas(x, wq, bq, wk, bk, wv, bv, alpha)
    out = jax.block_until_ready(out)

    ref = attention_ref(x, wq, bq, wk, bk, wv, bv, alpha)
    assert out.shape == (n, out_features)
    assert jnp.allclose(out, ref, atol=1e-4, rtol=1e-4), "mismatch vs reference"

    print("KERNEL_OK")
</pallas_src>

<mosaic_0001>
module attributes {stable_mosaic.version = 11 : i64} {
  func.func @_qkv_proj_kernel(%arg0: i32, %arg1: memref<128x128xf32, #tpu.memory_space<vmem>>, %arg2: memref<128x384xf32, #tpu.memory_space<vmem>>, %arg3: memref<1x384xf32, #tpu.memory_space<vmem>>, %arg4: memref<128x128xf32, #tpu.memory_space<vmem>>, %arg5: memref<128x128xf32, #tpu.memory_space<vmem>>, %arg6: memref<128x128xf32, #tpu.memory_space<vmem>>) attributes {dimension_semantics = [#tpu.dimension_semantics<parallel>], iteration_bounds = array<i64: 1>, scalar_prefetch = 0 : i64, scratch_operands = 0 : i64, tpu.core_type = #tpu.core_type<tc>, window_params = [{transform_indices = @transform_0, window_bounds = array<i64: 128, 128>}, {pipeline_mode = #tpu.pipeline_mode<synchronous>, transform_indices = @transform_1, window_bounds = array<i64: 128, 384>}, {pipeline_mode = #tpu.pipeline_mode<synchronous>, transform_indices = @transform_2, window_bounds = array<i64: 1, 384>}, {transform_indices = @transform_3, window_bounds = array<i64: 128, 128>}, {transform_indices = @transform_4, window_bounds = array<i64: 128, 128>}, {transform_indices = @transform_5, window_bounds = array<i64: 128, 128>}]} {
    %c0 = arith.constant 0 : index
    %c0_0 = arith.constant 0 : index
    %0 = vector.load %arg1[%c0, %c0_0] : memref<128x128xf32, #tpu.memory_space<vmem>>, vector<128x128xf32>
    %c0_1 = arith.constant 0 : index
    %c0_2 = arith.constant 0 : index
    %1 = vector.load %arg2[%c0_1, %c0_2] : memref<128x384xf32, #tpu.memory_space<vmem>>, vector<128x384xf32>
    %cst = arith.constant dense<0.000000e+00> : vector<128x384xf32>
    %2 = tpu.matmul %0, %1, %cst {dimension_numbers = #tpu.dot_dimension_numbers<[1], [0], [0], [1], [0, 0, 1, 1], [], []>} : vector<128x128xf32>, vector<128x384xf32>, vector<128x384xf32> -> vector<128x384xf32>
    %c0_3 = arith.constant 0 : index
    %c0_4 = arith.constant 0 : index
    %3 = vector.load %arg3[%c0_3, %c0_4] : memref<1x384xf32, #tpu.memory_space<vmem>>, vector<1x384xf32>
    %4 = vector.broadcast %3 : vector<1x384xf32> to vector<128x384xf32>
    %5 = arith.addf %2, %4 : vector<128x384xf32>
    %cst_5 = arith.constant 0.000000e+00 : f32
    %6 = vector.broadcast %cst_5 : f32 to vector<128x384xf32>
    %7 = arith.maximumf %5, %6 : vector<128x384xf32>
    %c128_i32 = arith.constant 128 : i32
    %8 = arith.muli %arg0, %c128_i32 : i32
    %9 = tpu.iota {dimensions = array<i32: 0>} : vector<128x1xi32>
    %10 = vector.broadcast %8 : i32 to vector<128x1xi32>
    %11 = arith.addi %10, %9 : vector<128x1xi32>
    %c8_i32 = arith.constant 8 : i32
    %12 = vector.broadcast %c8_i32 : i32 to vector<128x1xi32>
    %13 = arith.cmpi slt, %11, %12 : vector<128x1xi32>
    %14 = vector.extract_strided_slice %7 {offsets = [0, 0], sizes = [128, 128], strides = [1, 1]} : vector<128x384xf32> to vector<128x128xf32>
    %c0_6 = arith.constant 0 : index
    %c0_7 = arith.constant 0 : index
    %15 = vector.load %arg4[%c0_6, %c0_7] : memref<128x128xf32, #tpu.memory_space<vmem>>, vector<128x128xf32>
    tpu.vector_store %arg4[%c0_6, %c0_7], %14 {strides = array<i32>} : memref<128x128xf32, #tpu.memory_space<vmem>>, vector<128x128xf32>,
    %16 = vector.extract_strided_slice %7 {offsets = [0, 128], sizes = [128, 128], strides = [1, 1]} : vector<128x384xf32> to vector<128x128xf32>
    %cst_8 = arith.constant 0.000000e+00 : f32
    %17 = vector.shape_cast %13 : vector<128x1xi1> to vector<128x1xi1>
    %18 = vector.broadcast %17 : vector<128x1xi1> to vector<128x128xi1>
    %19 = vector.broadcast %cst_8 : f32 to vector<128x128xf32>
    %20 = arith.select %18, %16, %19 : vector<128x128xi1>, vector<128x128xf32>
    %c0_9 = arith.constant 0 : index
    %c0_10 = arith.constant 0 : index
    %21 = vector.load %arg5[%c0_9, %c0_10] : memref<128x128xf32, #tpu.memory_space<vmem>>, vector<128x128xf32>
    tpu.vector_store %arg5[%c0_9, %c0_10], %20 {strides = array<i32>} : memref<128x128xf32, #tpu.memory_space<vmem>>, vector<128x128xf32>,
    %22 = vector.extract_strided_slice %7 {offsets = [0, 256], sizes = [128, 128], strides = [1, 1]} : vector<128x384xf32> to vector<128x128xf32>
    %cst_11 = arith.constant 0.000000e+00 : f32
    %23 = vector.shape_cast %13 : vector<128x1xi1> to vector<128x1xi1>
    %24 = vector.broadcast %23 : vector<128x1xi1> to vector<128x128xi1>
    %25 = vector.broadcast %cst_11 : f32 to vector<128x128xf32>
    %26 = arith.select %24, %22, %25 : vector<128x128xi1>, vector<128x128xf32>
    %c0_12 = arith.constant 0 : index
    %c0_13 = arith.constant 0 : index
    %27 = vector.load %arg6[%c0_12, %c0_13] : memref<128x128xf32, #tpu.memory_space<vmem>>, vector<128x128xf32>
    tpu.vector_store %arg6[%c0_12, %c0_13], %26 {strides = array<i32>} : memref<128x128xf32, #tpu.memory_space<vmem>>, vector<128x128xf32>,
    return
  }
  func.func @transform_0(%arg0: i32) -> (i32, i32) {
    %c0_i32 = arith.constant 0 : i32
    %c0_i32_0 = arith.constant 0 : i32
    return %arg0, %c0_i32 : i32, i32
  }
  func.func @transform_1(%arg0: i32) -> (i32, i32) {
    %c0_i32 = arith.constant 0 : i32
    %c0_i32_0 = arith.constant 0 : i32
    %c0_i32_1 = arith.constant 0 : i32
    return %c0_i32, %c0_i32_0 : i32, i32
  }
  func.func @transform_2(%arg0: i32) -> (i32, i32) {
    %c0_i32 = arith.constant 0 : i32
    %c0_i32_0 = arith.constant 0 : i32
    %c0_i32_1 = arith.constant 0 : i32
    return %c0_i32, %c0_i32_0 : i32, i32
  }
  func.func @transform_3(%arg0: i32) -> (i32, i32) {
    %c0_i32 = arith.constant 0 : i32
    %c0_i32_0 = arith.constant 0 : i32
    return %arg0, %c0_i32 : i32, i32
  }
  func.func @transform_4(%arg0: i32) -> (i32, i32) {
    %c0_i32 = arith.constant 0 : i32
    %c0_i32_0 = arith.constant 0 : i32
    return %arg0, %c0_i32 : i32, i32
  }
  func.func @transform_5(%arg0: i32) -> (i32, i32) {
    %c0_i32 = arith.constant 0 : i32
    %c0_i32_0 = arith.constant 0 : i32
    return %arg0, %c0_i32 : i32, i32
  }
}

</mosaic_0001>

<bundles_post_ra>
// kernel: tpu_custom_call.1
= control target key start
LH: loop header
LB: loop body
LE: loop exit
PB: predicated region body
PF: predicated region fallthrough
CT: control target
= control target key end

     0   :  { %11 = vsyncpa [#allocation3], 0  ;;  %s1157_s0 = inlined_call_operand.hbm [shape: f32[128,128], index: 0, kind: input, shape index: {}]   ;;  %s1158_s1 = inlined_call_operand.hbm [shape: f32[128,384], index: 1, kind: input, shape index: {}]   ;;  %s1159_s2 = inlined_call_operand.vmem [shape: f32[1,384], index: 2, kind: input, shape index: {}]   ;;  %s1160_s3 = inlined_call_operand.hbm [shape: f32[128,128], index: 3, kind: output, shape index: {0}]   ;;  %s1161_s4 = inlined_call_operand.hbm [shape: f32[128,128], index: 4, kind: output, shape index: {1}]   ;;  %s1162_s5 = inlined_call_operand.hbm [shape: f32[128,128], index: 5, kind: output, shape index: {2}]  }
   0x1   :  { %12 = vsyncpa [#allocation6], 0 }
   0x2   :  { %13 = vsyncpa [#allocation4], 0 }
   0x3   :  { %14 = vsyncpa [#allocation9], 0  ;;  %s974_s18 = smov [#allocation2]   ;;  %s856_s22 = scalar_lea.hbm %s1157_s0, 2048 }
   0x4   :  { %s20_s19 = sshll.u32 %s974_s18, 4  ;;  %p857_p0 = scmp.ne.s32.totalorder %s1157_s0, %s856_s22  ;;  %s21_s19 = int_to_ptr.vmem [resolvable:$true] %s20_s19 }
   0x5   :  { %p860_p1 = scmp.lt.u32.totalorder %s856_s22, %s1157_s0 }
   0x7   :  { %p862_p2 = pnand %p860_p1, %p857_p0 }
   0x9   :  { %865 = shalt.err (!%p862_p2)
}
   0xa   :  { %s866_s27 = scalar_lea.vmem %s21_s19, 2048  ;;  %p871_p4 = scmp.lt.s32.totalorder %s21_s19, %s21_s19 }
   0xb   :  { %p867_p3 = scmp.ne.s32.totalorder %s21_s19, %s866_s27  ;;  %p872_p5 = scmp.lt.s32.totalorder %s866_s27, %s866_s27 }
   0xd   :  { %p873_p6 = por %p872_p5, %p871_p4 }
   0xf   :  { %p874_p7 = pnand %p873_p6, %p867_p3 }
  0x11   :  { %877 = shalt.err (!%p874_p7)
}
  0x12   :  { %s975_s28 = smov 128   ;;  %s976_s29 = smov 8  }
  0x13   :  { %26 = dma.hbm_to_vmem [thread:$0]  %s1157_s0, 2048, %s21_s19, [#allocation3], %s975_s28, %s975_s28, %s976_s29  }
  0x14   :  { %s977_s7 = smov [#allocation5]   ;;  %s878_s11 = scalar_lea.hbm %s1158_s1, 6144 }
  0x15   :  { %s32_s8 = sshll.u32 %s977_s7, 4  ;;  %p879_p8 = scmp.ne.s32.totalorder %s1158_s1, %s878_s11  ;;  %s33_s8 = int_to_ptr.vmem [resolvable:$true] %s32_s8 }
  0x16   :  { %p882_p9 = scmp.lt.u32.totalorder %s878_s11, %s1158_s1 }
  0x18   :  { %p884_p10 = pnand %p882_p9, %p879_p8 }
  0x1a   :  { %887 = shalt.err (!%p884_p10)
}
  0x1b   :  { %s888_s16 = scalar_lea.vmem %s33_s8, 6144  ;;  %p893_p12 = scmp.lt.s32.totalorder %s33_s8, %s33_s8 }
  0x1c   :  { %p889_p11 = scmp.ne.s32.totalorder %s33_s8, %s888_s16  ;;  %p894_p13 = scmp.lt.s32.totalorder %s888_s16, %s888_s16 }
  0x1e   :  { %p895_p0 = por %p894_p13, %p893_p12 }
  0x20   :  { %p896_p1 = pnand %p895_p0, %p889_p11 }
  0x22   :  { %899 = shalt.err (!%p896_p1)
}
  0x23   :  { %s978_s0 = smov 384   ;;  %s979_s17 = smov 24  }
  0x24   :  { %38 = dma.hbm_to_vmem [thread:$0]  %s1158_s1, 6144, %s33_s8, [#allocation6], %s978_s0, %s978_s0, %s979_s17  }
  0x25   :  { %966 = dma.done.wait [#allocation3], 2048  }
  0x26   :  { %967 = vsyncadd [#allocation3], 4294965248 }
  0x27   :  { %968 = dma.done.wait [#allocation6], 6144  }
  0x28   :  { %969 = vsyncadd [#allocation6], 4294961152  ;;  %v980_v0 = vmov 0.0   ;;  %v64_v1 = vld [vmem:[#allocation5 + $0x8] sm:$0xff]  ;;  %v67_v2 = vld [vmem:[#allocation5 + $0x20] sm:$0xff]  ;;  %s981_s21 = smov [#allocation8]  }
  0x29   :  { %192 = vmatprep.mubr.f32.mxu0 %v980_v0  ;;  %598 = vst [vmem:[#allocation8 + $0x8] sm:$0xff] %v980_v0  ;;  %599 = vst [vmem:[#allocation8 + $0x10] sm:$0xff] %v980_v0  ;;  %v63_v3 = vld [vmem:[#allocation5] sm:$0xff]  ;;  %v782_v4 = vpack.c.bf16 %v67_v2, %v64_v1  ;;  %v66_v5 = vld [vmem:[#allocation5 + $0x18] sm:$0xff]  ;;  %s662_s22 = sshll.u32 %s981_s21, 4  ;;  %s663_s22 = int_to_ptr.vmem [resolvable:$true] %s662_s22 }
  0x2a   :  { %600 = vst [vmem:[#allocation8 + $0x18] sm:$0xff] %v980_v0  ;;  %601 = vst [vmem:[#allocation8 + $0x20] sm:$0xff] %v980_v0  ;;  %v70_v6 = vld [vmem:[#allocation5 + $0x38] sm:$0xff]  ;;  %v73_v7 = vld [vmem:[#allocation5 + $0x50] sm:$0xff]  ;;  %v784_v8 = vpack.c.bf16 %v66_v5, %v63_v3  ;;  %p905_p3 = scmp.lt.s32.totalorder %s663_s22, %s663_s22 }
  0x2b   :  { %602 = vst [vmem:[#allocation8 + $0x28] sm:$0xff] %v980_v0  ;;  %603 = vst [vmem:[#allocation8 + $0x30] sm:$0xff] %v980_v0  ;;  %v786_v9 = vpack.c.bf16 %v73_v7, %v70_v6  ;;  %v69_v10 = vld [vmem:[#allocation5 + $0x30] sm:$0xff]  ;;  %v72_v11 = vld [vmem:[#allocation5 + $0x48] sm:$0xff]  ;;  %783 = vmatprep.subr.bf16.mxu0 %v782_v4 }
  0x2c   :  { %604 = vst [vmem:[#allocation8 + $0x38] sm:$0xff] %v980_v0  ;;  %605 = vst [vmem:[#allocation8 + $0x40] sm:$0xff] %v980_v0  ;;  %v76_v12 = vld [vmem:[#allocation5 + $0x68] sm:$0xff]  ;;  %v79_v13 = vld [vmem:[#allocation5 + $0x80] sm:$0xff]  ;;  %785 = vmatpush1.bf16.msra.mxu0 %v784_v8  ;;  %v788_v14 = vpack.c.bf16 %v72_v11, %v69_v10 }
  0x2d   :  { %606 = vst [vmem:[#allocation8 + $0x48] sm:$0xff] %v980_v0  ;;  %607 = vst [vmem:[#allocation8 + $0x50] sm:$0xff] %v980_v0  ;;  %787 = vmatprep.subr.bf16.mxu0 %v786_v9  ;;  %v790_v15 = vpack.c.bf16 %v79_v13, %v76_v12  ;;  %v75_v16 = vld [vmem:[#allocation5 + $0x60] sm:$0xff]  ;;  %v78_v17 = vld [vmem:[#allocation5 + $0x78] sm:$0xff] }
  0x2e   :  { %608 = vst [vmem:[#allocation8 + $0x58] sm:$0xff] %v980_v0  ;;  %609 = vst [vmem:[#allocation8 + $0x60] sm:$0xff] %v980_v0  ;;  %v82_v18 = vld [vmem:[#allocation5 + $0x98] sm:$0xff]  ;;  %v85_v19 = vld [vmem:[#allocation5 + $0xb0] sm:$0xff]  ;;  %v792_v20 = vpack.c.bf16 %v78_v17, %v75_v16 }
  0x2f   :  { %610 = vst [vmem:[#allocation8 + $0x68] sm:$0xff] %v980_v0  ;;  %611 = vst [vmem:[#allocation8 + $0x70] sm:$0xff] %v980_v0  ;;  %v794_v21 = vpack.c.bf16 %v85_v19, %v82_v18  ;;  %v81_v22 = vld [vmem:[#allocation5 + $0x90] sm:$0xff]  ;;  %v84_v23 = vld [vmem:[#allocation5 + $0xa8] sm:$0xff] }
  0x30   :  { %612 = vst [vmem:[#allocation8 + $0x78] sm:$0xff] %v980_v0  ;;  %630 = vst [vmem:[#allocation10 + $0x8] sm:$0xff] %v980_v0  ;;  %789 = vmatpush1.bf16.msra.mxu0 %v788_v14  ;;  %v88_v24 = vld [vmem:[#allocation5 + $0xc8] sm:$0xff]  ;;  %v91_v25 = vld [vmem:[#allocation5 + $0xe0] sm:$0xff]  ;;  %v796_v29 = vpack.c.bf16 %v84_v23, %v81_v22 }
  0x31   :  { %631 = vst [vmem:[#allocation10 + $0x10] sm:$0xff] %v980_v0  ;;  %632 = vst [vmem:[#allocation10 + $0x18] sm:$0xff] %v980_v0  ;;  %791 = vmatprep.subr.bf16.mxu0 %v790_v15  ;;  %v1072_v26 = vld [vmem:[#allocation2] sm:$0xff]  ;;  %v65_v27 = vld [vmem:[#allocation5 + $0x10] sm:$0xff]  ;;  %v798_v34 = vpack.c.bf16 %v91_v25, %v88_v24 }
  0x32   :  { %633 = vst [vmem:[#allocation10 + $0x20] sm:$0xff] %v980_v0  ;;  %634 = vst [vmem:[#allocation10 + $0x28] sm:$0xff] %v980_v0  ;;  %v68_v28 = vld [vmem:[#allocation5 + $0x28] sm:$0xff]  ;;  %758 = vmatprep.mubr.f32.mxu1 %v1072_v26  ;;  %v87_v30 = vld [vmem:[#allocation5 + $0xc0] sm:$0xff] }
  0x33   :  { %635 = vst [vmem:[#allocation10 + $0x30] sm:$0xff] %v980_v0  ;;  %636 = vst [vmem:[#allocation10 + $0x38] sm:$0xff] %v980_v0  ;;  %v814_v31 = vpack.c.bf16 %v68_v28, %v65_v27  ;;  %v71_v32 = vld [vmem:[#allocation5 + $0x40] sm:$0xff]  ;;  %v74_v33 = vld [vmem:[#allocation5 + $0x58] sm:$0xff] }
  0x34   :  { %637 = vst [vmem:[#allocation10 + $0x40] sm:$0xff] %v980_v0  ;;  %638 = vst [vmem:[#allocation10 + $0x48] sm:$0xff] %v980_v0  ;;  %793 = vmatpush1.bf16.msra.mxu0 %v792_v20  ;;  %v90_v35 = vld [vmem:[#allocation5 + $0xd8] sm:$0xff]  ;;  %v818_v36 = vpack.c.bf16 %v74_v33, %v71_v32  ;;  %v77_v37 = vld [vmem:[#allocation5 + $0x70] sm:$0xff] }
  0x35   :  { %639 = vst [vmem:[#allocation10 + $0x50] sm:$0xff] %v980_v0  ;;  %640 = vst [vmem:[#allocation10 + $0x58] sm:$0xff] %v980_v0  ;;  %795 = vmatprep.subr.bf16.mxu0 %v794_v21  ;;  %v80_v38 = vld [vmem:[#allocation5 + $0x88] sm:$0xff]  ;;  %v94_v39 = vld [vmem:[#allocation5 + $0xf8] sm:$0xff]  ;;  %815 = vmatprep.subr.bf16.mxu1 %v814_v31  ;;  %v800_v41 = vpack.c.bf16 %v90_v35, %v87_v30 }
  0x36   :  { %641 = vst [vmem:[#allocation10 + $0x60] sm:$0xff] %v980_v0  ;;  %642 = vst [vmem:[#allocation10 + $0x68] sm:$0xff] %v980_v0  ;;  %v97_v40 = vld [vmem:[#allocation5 + $0x110] sm:$0xff]  ;;  %817 = vmatpush3.bf16.msra.mxu1 %v814_v31  ;;  %v822_v43 = vpack.c.bf16 %v80_v38, %v77_v37  ;;  %v96_v45 = vld [vmem:[#allocation5 + $0x108] sm:$0xff] }
  0x37   :  { %643 = vst [vmem:[#allocation10 + $0x70] sm:$0xff] %v980_v0  ;;  %644 = vst [vmem:[#allocation10 + $0x78] sm:$0xff] %v980_v0  ;;  %v93_v42 = vld [vmem:[#allocation5 + $0xf0] sm:$0xff]  ;;  %819 = vmatprep.subr.bf16.mxu1 %v818_v36  ;;  %v802_v44 = vpack.c.bf16 %v97_v40, %v94_v39  ;;  %v83_v46 = vld [vmem:[#allocation5 + $0xa0] sm:$0xff] }
  0x38   :  { %797 = vmatpush1.bf16.msra.mxu0 %v796_v29  ;;  %v86_v47 = vld [vmem:[#allocation5 + $0xb8] sm:$0xff]  ;;  %v100_v48 = vld [vmem:[#allocation5 + $0x128] sm:$0xff]  ;;  %v103_v49 = vld [vmem:[#allocation5 + $0x140] sm:$0xff]  ;;  %v804_v50 = vpack.c.bf16 %v96_v45, %v93_v42 }
  0x39   :  { %799 = vmatprep.subr.bf16.mxu0 %v798_v34  ;;  %v99_v51 = vld [vmem:[#allocation5 + $0x120] sm:$0xff]  ;;  %v826_v52 = vpack.c.bf16 %v86_v47, %v83_v46  ;;  %v806_v53 = vpack.c.bf16 %v103_v49, %v100_v48  ;;  %v102_v54 = vld [vmem:[#allocation5 + $0x138] sm:$0xff]  ;;  %v89_v55 = vld [vmem:[#allocation5 + $0xd0] sm:$0xff] }
  0x3a   :  { %821 = vmatpush3.bf16.msra.mxu1 %v818_v36  ;;  %v92_v56 = vld [vmem:[#allocation5 + $0xe8] sm:$0xff]  ;;  %v106_v57 = vld [vmem:[#allocation5 + $0x158] sm:$0xff]  ;;  %v109_v58 = vld [vmem:[#allocation5 + $0x170] sm:$0xff]  ;;  %v808_v59 = vpack.c.bf16 %v102_v54, %v99_v51 }
  0x3b   :  { %823 = vmatprep.subr.bf16.mxu1 %v822_v43  ;;  %v105_v60 = vld [vmem:[#allocation5 + $0x150] sm:$0xff]  ;;  %v830_v61 = vpack.c.bf16 %v92_v56, %v89_v55  ;;  %v810_v62 = vpack.c.bf16 %v109_v58, %v106_v57  ;;  %v108_v63 = vld [vmem:[#allocation5 + $0x168] sm:$0xff]  ;;  %v95_v1 = vld [vmem:[#allocation5 + $0x100] sm:$0xff] }
  0x3c   :  { %801 = vmatpush1.bf16.msra.mxu0 %v800_v41  ;;  %v98_v2 = vld [vmem:[#allocation5 + $0x118] sm:$0xff]  ;;  %v812_v3 = vpack.c.bf16 %v108_v63, %v105_v60  ;;  %v101_v5 = vld [vmem:[#allocation5 + $0x130] sm:$0xff]  ;;  %v104_v6 = vld [vmem:[#allocation5 + $0x148] sm:$0xff] }
  0x3d   :  { %803 = vmatprep.subr.bf16.mxu0 %v802_v44  ;;  %v834_v4 = vpack.c.bf16 %v98_v2, %v95_v1  ;;  %v838_v7 = vpack.c.bf16 %v104_v6, %v101_v5  ;;  %v107_v8 = vld [vmem:[#allocation5 + $0x160] sm:$0xff]  ;;  %v110_v9 = vld [vmem:[#allocation5 + $0x178] sm:$0xff]  ;;  %v48_v10 = vld [vmem:[#allocation2 + $0x8] sm:$0xff] }
  0x3e   :  { %825 = vmatpush3.bf16.msra.mxu1 %v822_v43  ;;  %v842_v11 = vpack.c.bf16 %v110_v9, %v107_v8  ;;  %v49_v12 = vld [vmem:[#allocation2 + $0x10] sm:$0xff]  ;;  %v50_v13 = vld [vmem:[#allocation2 + $0x18] sm:$0xff]  ;;  %v51_v14 = vld [vmem:[#allocation2 + $0x20] sm:$0xff] }
  0x3f   :  { %827 = vmatprep.subr.bf16.mxu1 %v826_v52  ;;  %v52_v15 = vld [vmem:[#allocation2 + $0x28] sm:$0xff]  ;;  %v53_v16 = vld [vmem:[#allocation2 + $0x30] sm:$0xff]  ;;  %v54_v17 = vld [vmem:[#allocation2 + $0x38] sm:$0xff] }
  0x40   :  { %805 = vmatpush1.bf16.msra.mxu0 %v804_v50  ;;  %v55_v18 = vld [vmem:[#allocation2 + $0x40] sm:$0xff]  ;;  %v56_v19 = vld [vmem:[#allocation2 + $0x48] sm:$0xff]  ;;  %v57_v20 = vld [vmem:[#allocation2 + $0x50] sm:$0xff] }
  0x41   :  { %807 = vmatprep.subr.bf16.mxu0 %v806_v53  ;;  %v58_v21 = vld [vmem:[#allocation2 + $0x58] sm:$0xff]  ;;  %v59_v22 = vld [vmem:[#allocation2 + $0x60] sm:$0xff]  ;;  %v60_v23 = vld [vmem:[#allocation2 + $0x68] sm:$0xff] }
  0x42   :  { %829 = vmatpush3.bf16.msra.mxu1 %v826_v52  ;;  %v61_v24 = vld [vmem:[#allocation2 + $0x70] sm:$0xff]  ;;  %v62_v25 = vld [vmem:[#allocation2 + $0x78] sm:$0xff]  ;;  %v111_v29 = vld [vmem:[%s1159_s2] sm:$0x7]  ;;  %s900_s2 = scalar_lea.vmem %s663_s22, 2048 }
  0x43   :  { %831 = vmatprep.subr.bf16.mxu1 %v830_v61  ;;  %p901_p2 = scmp.ne.s32.totalorder %s663_s22, %s900_s2  ;;  %p906_p4 = scmp.lt.s32.totalorder %s900_s2, %s900_s2 }
  0x44   :  { %809 = vmatpush1.bf16.msra.mxu0 %v808_v59 }
  0x45   :  { %811 = vmatprep.subr.bf16.mxu0 %v810_v62  ;;  %p907_p5 = por %p906_p4, %p905_p3 }
  0x46   :  { %833 = vmatpush3.bf16.msra.mxu1 %v830_v61 }
  0x47   :  { %835 = vmatprep.subr.bf16.mxu1 %v834_v4  ;;  %p908_p6 = pnand %p907_p5, %p901_p2 }
  0x48   :  { %813 = vmatpush1.bf16.msra.mxu0 %v812_v3 }
  0x4a   :  { %837 = vmatpush3.bf16.msra.mxu1 %v834_v4 }
  0x4b   :  { %193 = vmatmul.mubr.f32.vlgmr.msra.gmra.mrb[0].mxu0 %v1072_v26  ;;  %839 = vmatprep.subr.bf16.mxu1 %v838_v7  ;;  %v113_v26 = vlaneseq }
  0x4c   :  { %198 = vmatprep.mubr.f32.mxu0 %v980_v0 }
  0x4d   :  { %v114_v27 = vshrl.u32 %v113_v26, 7 }
  0x4e   :  { %841 = vmatpush3.bf16.msra.mxu1 %v838_v7 }
  0x4f   :  { %199 = vmatmul.mubr.f32.gmra.mrb[2].mxu0 %v48_v10  ;;  %843 = vmatprep.subr.bf16.mxu1 %v842_v11  ;;  %v115_v28 = vsub.s32 0, %v114_v27  ;;  %v119_v30 = vsub.s32 1, %v114_v27  ;;  %v123_v41 = vsub.s32 2, %v114_v27 }
  0x50   :  { %204 = vmatprep.mubr.f32.mxu0 %v980_v0 }
  0x51   :  { %v1094_v31 = vrot.slane %v111_v29, %v115_v28  ;;  %v120_v32 = vrot.slane %v111_v29, %v119_v30 }
  0x52   :  { %845 = vmatpush3.bf16.msra.mxu1 %v842_v11 }
  0x53   :  { %205 = vmatmul.mubr.f32.gmra.mrb[4].mxu0 %v49_v12 }
  0x54   :  { %210 = vmatprep.mubr.f32.mxu0 %v980_v0 }
  0x55   :  { %759 = vmatmul.mubr.f32.vlgmr.msra.gmra.mrb[0].mxu1 %v48_v10 }
  0x56   :  { %761 = vmatprep.mubr.f32.mxu1 %v49_v12 }
  0x57   :  { %211 = vmatmul.mubr.f32.gmra.mrb[6].mxu0 %v50_v13 }
  0x58   :  { %216 = vmatprep.mubr.f32.mxu0 %v980_v0 }
  0x59   :  { %762 = vmatmul.mubr.f32.gmra.mrb[2].mxu1 %v50_v13 }
  0x5a   :  { %764 = vmatprep.mubr.f32.mxu1 %v51_v14 }
  0x5b   :  { %217 = vmatmul.mubr.f32.gmra.mrb[8].mxu0 %v51_v14 }
  0x5c   :  { %222 = vmatprep.mubr.f32.mxu0 %v980_v0 }
  0x5d   :  { %765 = vmatmul.mubr.f32.gmra.mrb[4].mxu1 %v52_v15 }
  0x5e   :  { %767 = vmatprep.mubr.f32.mxu1 %v53_v16 }
  0x5f   :  { %223 = vmatmul.mubr.f32.gmra.mrb[10].mxu0 %v52_v15 }
  0x60   :  { %228 = vmatprep.mubr.f32.mxu0 %v980_v0 }
  0x61   :  { %768 = vmatmul.mubr.f32.gmra.mrb[6].mxu1 %v54_v17 }
  0x62   :  { %770 = vmatprep.mubr.f32.mxu1 %v55_v18 }
  0x63   :  { %229 = vmatmul.mubr.f32.gmra.mrb[12].mxu0 %v53_v16 }
  0x64   :  { %234 = vmatprep.mubr.f32.mxu0 %v980_v0 }
  0x65   :  { %771 = vmatmul.mubr.f32.gmra.mrb[8].mxu1 %v56_v19 }
  0x66   :  { %773 = vmatprep.mubr.f32.mxu1 %v57_v20 }
  0x67   :  { %235 = vmatmul.mubr.f32.gmra.mrb[14].mxu0 %v54_v17 }
  0x68   :  { %240 = vmatprep.mubr.f32.mxu0 %v980_v0 }
  0x69   :  { %774 = vmatmul.mubr.f32.gmra.mrb[10].mxu1 %v58_v21 }
  0x6a   :  { %776 = vmatprep.mubr.f32.mxu1 %v59_v22 }
  0x6b   :  { %241 = vmatmul.mubr.f32.gmra.mrb[16].mxu0 %v55_v18 }
  0x6c   :  { %246 = vmatprep.mubr.f32.mxu0 %v980_v0 }
  0x6d   :  { %777 = vmatmul.mubr.f32.gmra.mrb[12].mxu1 %v60_v23 }
  0x6e   :  { %779 = vmatprep.mubr.f32.mxu1 %v61_v24 }
  0x6f   :  { %247 = vmatmul.mubr.f32.gmra.mrb[18].mxu0 %v56_v19 }
  0x70   :  { %252 = vmatprep.mubr.f32.mxu0 %v980_v0 }
  0x71   :  { %780 = vmatmul.mubr.f32.gmra.mrb[14].mxu1 %v62_v25 }
  0x73   :  { %253 = vmatmul.mubr.f32.gmra.mrb[20].mxu0 %v57_v20 }
  0x74   :  { %258 = vmatprep.mubr.f32.mxu0 %v980_v0 }
  0x77   :  { %259 = vmatmul.mubr.f32.gmra.mrb[22].mxu0 %v58_v21 }
  0x78   :  { %264 = vmatprep.mubr.f32.mxu0 %v980_v0 }
  0x7b   :  { %265 = vmatmul.mubr.f32.gmra.mrb[24].mxu0 %v59_v22 }
  0x7c   :  { %270 = vmatprep.mubr.f32.mxu0 %v980_v0 }
  0x7f   :  { %271 = vmatmul.mubr.f32.gmra.mrb[26].mxu0 %v60_v23 }
  0x80   :  { %276 = vmatprep.mubr.f32.mxu0 %v980_v0 }
  0x83   :  { %277 = vmatmul.mubr.f32.gmra.mrb[28].mxu0 %v61_v24 }
  0x84   :  { %282 = vmatprep.mubr.f32.mxu0 %v980_v0 }
  0x87   :  { %283 = vmatmul.mubr.f32.gmra.mrb[30].mxu0 %v62_v25 }
 0x11e   :  { %v194_v33 = vpop.f32.mrb[0].mxu0 }
 0x11f   :  { %v195_v34 = vadd.f32 %v194_v33, %v1094_v31  ;;  %v196_v35 = vpop.f32.mrb[1].mxu0 }
 0x120   :  { %v197_v36 = vadd.f32 %v196_v35, %v120_v32 }
 0x121   :  { %v434_v0 = vmax.f32 %v195_v34, 0.0 }
 0x122   :  { %v435_v37 = vmax.f32 %v197_v36, 0.0  ;;  %v200_v38 = vpop.f32.mrb[2].mxu0 }
 0x123   :  { %533 = vst [vmem:[#allocation7] sm:$0xff] %v434_v0  ;;  %v201_v39 = vadd.f32 %v200_v38, %v1094_v31  ;;  %v202_v40 = vpop.f32.mrb[3].mxu0 }
 0x124   :  { %597 = vst [vmem:[#allocation8] sm:$0xff] %v435_v37 }
 0x125   :  { %v437_v42 = vmax.f32 %v201_v39, 0.0 }
 0x126   :  { %911 = shalt.err (!%p908_p6)
}
 0x127   :  { %s912_s25 = scalar_lea.hbm %s1161_s4, 2048 }
 0x128   :  { %p913_p7 = scmp.ne.s32.totalorder %s1161_s4, %s912_s25  ;;  %p916_p8 = scmp.lt.u32.totalorder %s912_s25, %s1161_s4 }
 0x12a   :  { %p918_p9 = pnand %p916_p8, %p913_p7 }
 0x12c   :  { %921 = shalt.err (!%p918_p9)
}
 0x12d   :  { %668 = dma.vmem_to_hbm [thread:$0]  %s663_s22, 2048, %s1161_s4, [#allocation9], %s975_s28, %s975_s28, %s976_s29   ;;  %v206_v43 = vpop.f32.mrb[4].mxu0  ;;  %534 = vst [vmem:[#allocation7 + $0x8] sm:$0xff] %v437_v42  ;;  %v124_v46 = vrot.slane %v111_v29, %v123_v41  ;;  %v760_v48 = vpop.f32.mrb[0].mxu1 }
 0x12e   :  { %v207_v44 = vadd.f32 %v206_v43, %v1094_v31  ;;  %v208_v45 = vpop.f32.mrb[5].mxu0  ;;  %v355_v50 = vpop.f32.mrb[1].mxu1  ;;  %s982_s9 = smov [#allocation10]  }
 0x12f   :  { %v212_v49 = vpop.f32.mrb[6].mxu0  ;;  %s674_s10 = sshll.u32 %s982_s9, 4  ;;  %v356_v53 = vadd.f32 %v355_v50, %v124_v46  ;;  %v763_v56 = vpop.f32.mrb[2].mxu1  ;;  %s675_s10 = int_to_ptr.vmem [resolvable:$true] %s674_s10 }
 0x130   :  { %v440_v47 = vmax.f32 %v207_v44, 0.0  ;;  %v213_v51 = vadd.f32 %v212_v49, %v1094_v31  ;;  %v214_v52 = vpop.f32.mrb[7].mxu0  ;;  %v365_v58 = vpop.f32.mrb[3].mxu1  ;;  %s922_s4 = scalar_lea.vmem %s675_s10, 2048  ;;  %p927_p11 = scmp.lt.s32.totalorder %s675_s10, %s675_s10 }
 0x131   :  { %v436_v55 = vmax.f32 %v356_v53, 0.0  ;;  %v218_v57 = vpop.f32.mrb[8].mxu0  ;;  %p923_p10 = scmp.ne.s32.totalorder %s675_s10, %s922_s4  ;;  %p928_p12 = scmp.lt.s32.totalorder %s922_s4, %s922_s4 }
 0x132   :  { %535 = vst [vmem:[#allocation7 + $0x10] sm:$0xff] %v440_v47  ;;  %v443_v54 = vmax.f32 %v213_v51, 0.0  ;;  %v219_v59 = vadd.f32 %v218_v57, %v1094_v31  ;;  %v220_v60 = vpop.f32.mrb[9].mxu0 }
 0x133   :  { %629 = vst [vmem:[#allocation10] sm:$0xff] %v436_v55  ;;  %p929_p13 = por %p928_p12, %p927_p11 }
 0x134   :  { %536 = vst [vmem:[#allocation7 + $0x18] sm:$0xff] %v443_v54 }
 0x135   :  { %p930_p0 = pnand %p929_p13, %p923_p10 }
 0x137   :  { %933 = shalt.err (!%p930_p0)
}
 0x138   :  { %s934_s13 = scalar_lea.hbm %s1162_s5, 2048 }
 0x139   :  { %p935_p1 = scmp.ne.s32.totalorder %s1162_s5, %s934_s13  ;;  %p938_p2 = scmp.lt.u32.totalorder %s934_s13, %s1162_s5 }
 0x13b   :  { %p940_p3 = pnand %p938_p2, %p935_p1 }
 0x13d   :  { %943 = shalt.err (!%p940_p3)
}
 0x13e   :  { %680 = dma.vmem_to_hbm [thread:$0]  %s675_s10, 2048, %s1162_s5, [#allocation9], %s975_s28, %s975_s28, %s976_s29   ;;  %v446_v61 = vmax.f32 %v219_v59, 0.0  ;;  %v766_v62 = vpop.f32.mrb[4].mxu1  ;;  %v224_v63 = vpop.f32.mrb[10].mxu0 }
 0x13f   :  { %v375_v1 = vpop.f32.mrb[5].mxu1  ;;  %v225_v2 = vadd.f32 %v224_v63, %v1094_v31  ;;  %v226_v3 = vpop.f32.mrb[11].mxu0  ;;  %s983_s5 = smov [#allocation7]  }
 0x140   :  { %537 = vst [vmem:[#allocation7 + $0x20] sm:$0xff] %v446_v61  ;;  %v769_v5 = vpop.f32.mrb[6].mxu1  ;;  %v230_v6 = vpop.f32.mrb[12].mxu0  ;;  %s650_s19 = sshll.u32 %s983_s5, 4  ;;  %s651_s19 = int_to_ptr.vmem [resolvable:$true] %s650_s19 }
 0x141   :  { %v449_v4 = vmax.f32 %v225_v2, 0.0  ;;  %v385_v7 = vpop.f32.mrb[7].mxu1  ;;  %v231_v8 = vadd.f32 %v230_v6, %v1094_v31  ;;  %v232_v9 = vpop.f32.mrb[13].mxu0  ;;  %s944_s1 = scalar_lea.vmem %s651_s19, 2048  ;;  %p949_p5 = scmp.lt.s32.totalorder %s651_s19, %s651_s19 }
 0x142   :  { %v772_v11 = vpop.f32.mrb[8].mxu1  ;;  %v236_v12 = vpop.f32.mrb[14].mxu0  ;;  %p945_p4 = scmp.ne.s32.totalorder %s651_s19, %s944_s1  ;;  %p950_p6 = scmp.lt.s32.totalorder %s944_s1, %s944_s1 }
 0x143   :  { %538 = vst [vmem:[#allocation7 + $0x28] sm:$0xff] %v449_v4  ;;  %v452_v10 = vmax.f32 %v231_v8, 0.0  ;;  %v395_v13 = vpop.f32.mrb[9].mxu1  ;;  %v237_v14 = vadd.f32 %v236_v12, %v1094_v31  ;;  %v238_v15 = vpop.f32.mrb[15].mxu0 }
 0x144   :  { %v775_v17 = vpop.f32.mrb[10].mxu1  ;;  %v242_v18 = vpop.f32.mrb[16].mxu0  ;;  %p951_p7 = por %p950_p6, %p949_p5 }
 0x145   :  { %539 = vst [vmem:[#allocation7 + $0x30] sm:$0xff] %v452_v10  ;;  %v455_v16 = vmax.f32 %v237_v14, 0.0  ;;  %v405_v19 = vpop.f32.mrb[11].mxu1  ;;  %v243_v20 = vadd.f32 %v242_v18, %v1094_v31  ;;  %v244_v21 = vpop.f32.mrb[17].mxu0 }
 0x146   :  { %v778_v23 = vpop.f32.mrb[12].mxu1  ;;  %v248_v24 = vpop.f32.mrb[18].mxu0  ;;  %p952_p8 = pnand %p951_p7, %p945_p4 }
 0x147   :  { %540 = vst [vmem:[#allocation7 + $0x38] sm:$0xff] %v455_v16  ;;  %v458_v22 = vmax.f32 %v243_v20, 0.0  ;;  %v415_v25 = vpop.f32.mrb[13].mxu1  ;;  %v249_v26 = vadd.f32 %v248_v24, %v1094_v31  ;;  %v250_v27 = vpop.f32.mrb[19].mxu0 }
 0x148   :  { %v781_v29 = vpop.f32.mrb[14].mxu1  ;;  %v254_v30 = vpop.f32.mrb[20].mxu0 }
 0x149   :  { %541 = vst [vmem:[#allocation7 + $0x40] sm:$0xff] %v458_v22  ;;  %v461_v28 = vmax.f32 %v249_v26, 0.0  ;;  %v425_v32 = vpop.f32.mrb[15].mxu1  ;;  %v255_v33 = vadd.f32 %v254_v30, %v1094_v31  ;;  %v256_v34 = vpop.f32.mrb[21].mxu0 }
 0x14a   :  { %v260_v36 = vpop.f32.mrb[22].mxu0 }
 0x14b   :  { %542 = vst [vmem:[#allocation7 + $0x48] sm:$0xff] %v461_v28  ;;  %v464_v35 = vmax.f32 %v255_v33, 0.0  ;;  %v261_v0 = vadd.f32 %v260_v36, %v1094_v31  ;;  %v262_v37 = vpop.f32.mrb[23].mxu0 }
 0x14d   :  { %543 = vst [vmem:[#allocation7 + $0x50] sm:$0xff] %v464_v35  ;;  %v467_v38 = vmax.f32 %v261_v0, 0.0 }
 0x14e   :  { %v266_v39 = vpop.f32.mrb[24].mxu0 }
 0x14f   :  { %544 = vst [vmem:[#allocation7 + $0x58] sm:$0xff] %v467_v38  ;;  %v267_v40 = vadd.f32 %v266_v39, %v1094_v31  ;;  %v268_v41 = vpop.f32.mrb[25].mxu0 }
 0x151   :  { %v470_v42 = vmax.f32 %v267_v40, 0.0 }
 0x152   :  { %v272_v43 = vpop.f32.mrb[26].mxu0 }
 0x153   :  { %545 = vst [vmem:[#allocation7 + $0x60] sm:$0xff] %v470_v42  ;;  %v273_v44 = vadd.f32 %v272_v43, %v1094_v31  ;;  %v274_v45 = vpop.f32.mrb[27].mxu0 }
 0x155   :  { %v473_v46 = vmax.f32 %v273_v44, 0.0 }
 0x156   :  { %v278_v47 = vpop.f32.mrb[28].mxu0 }
 0x157   :  { %546 = vst [vmem:[#allocation7 + $0x68] sm:$0xff] %v473_v46  ;;  %v279_v48 = vadd.f32 %v278_v47, %v1094_v31  ;;  %v280_v49 = vpop.f32.mrb[29].mxu0 }
 0x159   :  { %v476_v50 = vmax.f32 %v279_v48, 0.0 }
 0x15a   :  { %v284_v51 = vpop.f32.mrb[30].mxu0 }
 0x15b   :  { %547 = vst [vmem:[#allocation7 + $0x70] sm:$0xff] %v476_v50  ;;  %v285_v52 = vadd.f32 %v284_v51, %v1094_v31  ;;  %v286_v53 = vpop.f32.mrb[31].mxu0 }
 0x15d   :  { %v479_v54 = vmax.f32 %v285_v52, 0.0 }
 0x15f   :  { %548 = vst [vmem:[#allocation7 + $0x78] sm:$0xff] %v479_v54 }
 0x160   :  { %955 = shalt.err (!%p952_p8)
}
 0x161   :  { %s956_s22 = scalar_lea.hbm %s1160_s3, 2048 }
 0x162   :  { %p957_p9 = scmp.ne.s32.totalorder %s1160_s3, %s956_s22  ;;  %p960_p10 = scmp.lt.u32.totalorder %s956_s22, %s1160_s3 }
 0x164   :  { %p962_p11 = pnand %p960_p10, %p957_p9 }
 0x166   :  { %965 = shalt.err (!%p962_p11)
}
 0x167   :  { %656 = dma.vmem_to_hbm [thread:$0]  %s651_s19, 2048, %s1160_s3, [#allocation4], %s975_s28, %s975_s28, %s976_s29  }
 0x168   :  { %970 = dma.done.wait [#allocation4], 2048  }
 0x169   :  { %971 = vsyncadd [#allocation4], 4294965248 }
 0x16a   :  { %972 = dma.done.wait [#allocation9], 4096  }
 0x16b   :  { %973 = vsyncadd [#allocation9], 4294963200 }
 0x16c   :  { %690 = vsyncpa [#allocation3], 1 }
 0x16d   :  { %691 = vsyncpa [#allocation6], 1 }
 0x16e   :  { %692 = vsyncpa [#allocation4], 1 }
 0x16f   :  { %693 = vsyncpa [#allocation9], 1 }

</bundles_post_ra>
